<compile_context>
chip_gen: v7x
topology: tpu7x:2x2x1
jax: 0.10.0
libtpu: 0.0.40
codegen_flags: <defaults>
</compile_context>

<pallas_src>
import functools

import numpy as np

import jax
import jax.numpy as jnp
from jax.experimental import pallas as pl
from jax.experimental.pallas import tpu as pltpu

BN_EPS = 1e-5
GN_EPS = 1e-5


# --------------------------------------------------------------------------
# pltpu.roll sign-convention probe (cheap, one-time): guarantees the 3x3 tap
# shifts are correct regardless of the rotate direction convention.
# --------------------------------------------------------------------------
_ROLL_LIKE_NP_CACHE = None


def _roll_probe_kernel(x_ref, o_ref):
    o_ref[...] = pltpu.roll(x_ref[...], 1, 1)


def _roll_like_numpy():
    """True iff pltpu.roll(x, s, axis) follows np.roll semantics."""
    global _ROLL_LIKE_NP_CACHE
    if _ROLL_LIKE_NP_CACHE is None:
        x = jnp.tile(jnp.arange(128, dtype=jnp.float32)[None, :], (8, 1))
        y = pl.pallas_call(
            _roll_probe_kernel,
            out_shape=jax.ShapeDtypeStruct((8, 128), jnp.float32),
        )(x)
        # np.roll(x, 1): out[0] = x[-1] = 127 ; opposite convention: out[0] = 1
        _ROLL_LIKE_NP_CACHE = bool(y[0, 0] == 127.0)
    return _ROLL_LIKE_NP_CACHE


# --------------------------------------------------------------------------
# Host-side constant builders (static shapes -> numpy, folded into the call)
# --------------------------------------------------------------------------
def _build_interleave_perm(Hs, Ws, Hh, Ww, pad_top, pad_left):
    """0/1 matrix mapping (phase d, x1-position p1) -> padded raster position q."""
    P1 = Hs * Ws
    perm = np.zeros((4 * P1, Hh * Ww), np.float32)
    for dh in range(2):
        for dw in range(2):
            d = dh * 2 + dw
            for h in range(Hs):
                for w in range(Ws):
                    q = (2 * h + dh + pad_top) * Ww + (2 * w + dw + pad_left)
                    perm[d * P1 + h * Ws + w, q] = 1.0
    return jnp.asarray(perm)


def _build_tap_masks(Hh, Ww):
    """(9, 1, P) validity masks for the 3x3 taps (zero-padding boundaries)."""
    P = Hh * Ww
    masks = np.zeros((9, 1, P), np.float32)
    hh = np.arange(Hh)[:, None]
    ww = np.arange(Ww)[None, :]
    for k in range(9):
        dh, dw = k // 3 - 1, k % 3 - 1
        valid = ((hh + dh >= 0) & (hh + dh < Hh) &
                 (ww + dw >= 0) & (ww + dw < Ww))
        masks[k, 0, :] = valid.astype(np.float32).reshape(P)
    return jnp.asarray(masks)


# --------------------------------------------------------------------------
# Fused kernel: one batch sample per grid step, channel-major (C, P) layout.
# --------------------------------------------------------------------------
def _ru_up_kernel(x1_ref, x2_ref, wt_ref, bt_ref, perm_ref,
                  w1_ref, s1_ref, b1_ref, drop_ref,
                  w2_ref, s2_ref, b2_ref,
                  wr_ref, gg_ref, gb_ref, gm_ref, gmt_ref, mask_ref,
                  o_ref, *, ww, roll_like_np):
    C1 = x1_ref.shape[1]
    P1 = x1_ref.shape[2]
    P = x2_ref.shape[2]
    Cout = o_ref.shape[1]
    G = gm_ref.shape[0]
    cg = Cout // G

    dot = functools.partial(jnp.dot,
                            precision=jax.lax.Precision.HIGHEST,
                            preferred_element_type=jnp.float32)

    # ---- ConvTranspose2d(k=2, s=2): one stacked (4*C1, C1)@(C1, P1) matmul;
    #      the stride-2 interleave + top/left zero pad is a permutation matmul.
    #      Bias (stacked per phase) is added BEFORE the permutation so padded
    #      positions stay exactly 0.
    up_stack = dot(wt_ref[...], x1_ref[0]) + bt_ref[...]         # (4*C1, P1)
    perm = perm_ref[...]                                         # (4*P1, P)
    up_img = None
    for d in range(4):
        part = dot(up_stack[d * C1:(d + 1) * C1, :],
                   perm[d * P1:(d + 1) * P1, :])                 # (C1, P)
        up_img = part if up_img is None else up_img + part

    # ---- channel concat([x2, upsampled x1]) -> (Cin, P), lane-dense
    x = jnp.concatenate([x2_ref[0], up_img], axis=0)             # (2*C1, P)

    # ---- 3x3 conv (pad=1) as ONE K=9*C matmul; taps are lane rolls of the
    #      flattened image (XLU) + precomputed boundary masks.
    def conv3x3(z, w_flat):
        taps = []
        for k in range(9):
            dh, dw = k // 3 - 1, k % 3 - 1
            s = dh * ww + dw
            if s == 0:
                taps.append(z)                                   # center: all-valid
            else:
                amt = (-s) % P if roll_like_np else s % P
                taps.append(pltpu.roll(z, amt, 1) * mask_ref[k]) # (C, P)
        im2col = jnp.concatenate(taps, axis=0)                   # (9*C, P)
        return dot(w_flat, im2col)                               # (Cout, P)

    # conv1 -> folded BN1 -> ReLU -> MC-dropout (pre-scaled mask)
    h1 = jnp.maximum(conv3x3(x, w1_ref[...]) * s1_ref[...] + b1_ref[...], 0.0)
    h1 = h1 * drop_ref[0]
    # conv2 -> folded BN2
    ft1 = conv3x3(h1, w2_ref[...]) * s2_ref[...] + b2_ref[...]

    # ---- residual: 1x1 conv + GroupNorm (two-pass mean/var), final ReLU
    r = dot(wr_ref[...], x)                                      # (Cout, P)
    inv_cnt = 1.0 / float(P * cg)
    s_c = jnp.sum(r, axis=1, keepdims=True)                      # (Cout, 1)
    if cg == 1:
        mean_c = s_c * inv_cnt
    else:
        mean_c = dot(gmt_ref[...], dot(gm_ref[...], s_c)) * inv_cnt
    centered = r - mean_c
    ss_c = jnp.sum(centered * centered, axis=1, keepdims=True)   # (Cout, 1)
    if cg == 1:
        var_c = ss_c * inv_cnt
    else:
        var_c = dot(gmt_ref[...], dot(gm_ref[...], ss_c)) * inv_cnt
    gn = centered * jax.lax.rsqrt(var_c + GN_EPS) * gg_ref[...] + gb_ref[...]

    o_ref[0] = jnp.maximum(gn + ft1, 0.0).astype(o_ref.dtype)


# --------------------------------------------------------------------------
# Full RU_up_MCD forward (NCHW in / NCHW out) -- single pallas_call.
# --------------------------------------------------------------------------
def ru_up_mcd_forward(x1_nchw, x2_nchw, kp, drop_mask_flat):
    N, C1, Hs, Ws = x1_nchw.shape
    _, C2, Hh, Ww = x2_nchw.shape
    assert C2 == C1
    Cout = kp["w1_k"].shape[0]
    Cin = 2 * C1
    P1, P = Hs * Ws, Hh * Ww
    G = kp["gm"].shape[0]

    # with_skip: F.pad(x1, (diff_y, 0, diff_x, 0)) pads top/left to x2's size.
    pad_top, pad_left = Hh - 2 * Hs, Ww - 2 * Ws
    perm = _build_interleave_perm(Hs, Ws, Hh, Ww, pad_top, pad_left)
    mask9 = _build_tap_masks(Hh, Ww)

    # NCHW is already channel-major: flatten spatial dims (no transposes).
    x1f = x1_nchw.reshape(N, C1, P1)
    x2f = x2_nchw.reshape(N, C1, P)

    kernel = functools.partial(_ru_up_kernel, ww=Ww,
                               roll_like_np=_roll_like_numpy())

    out_flat = pl.pallas_call(
        kernel,
        out_shape=jax.ShapeDtypeStruct((N, Cout, P), jnp.float32),
        grid_spec=pltpu.PrefetchScalarGridSpec(
            num_scalar_prefetch=0,
            grid=(N,),
            in_specs=[
                pl.BlockSpec((1, C1, P1), lambda b: (b, 0, 0)),     # x1
                pl.BlockSpec((1, C1, P), lambda b: (b, 0, 0)),      # x2
                pl.BlockSpec((4 * C1, C1), lambda b: (0, 0)),       # wt (stacked)
                pl.BlockSpec((4 * C1, 1), lambda b: (0, 0)),        # bt (stacked)
                pl.BlockSpec((4 * P1, P), lambda b: (0, 0)),        # interleave perm
                pl.BlockSpec((Cout, 9 * Cin), lambda b: (0, 0)),    # w1 (Cout, 9*Cin)
                pl.BlockSpec((Cout, 1), lambda b: (0, 0)),          # s1 (BN1 scale)
                pl.BlockSpec((Cout, 1), lambda b: (0, 0)),          # b1 (BN1 bias)
                pl.BlockSpec((1, Cout, P), lambda b: (b, 0, 0)),    # dropout mask
                pl.BlockSpec((Cout, 9 * Cout), lambda b: (0, 0)),   # w2
                pl.BlockSpec((Cout, 1), lambda b: (0, 0)),          # s2
                pl.BlockSpec((Cout, 1), lambda b: (0, 0)),          # b2
                pl.BlockSpec((Cout, Cin), lambda b: (0, 0)),        # wr (1x1 conv)
                pl.BlockSpec((Cout, 1), lambda b: (0, 0)),          # gn gamma
                pl.BlockSpec((Cout, 1), lambda b: (0, 0)),          # gn beta
                pl.BlockSpec((G, Cout), lambda b: (0, 0)),          # group one-hot
                pl.BlockSpec((Cout, G), lambda b: (0, 0)),          # its transpose
                pl.BlockSpec((9, 1, P), lambda b: (0, 0, 0)),       # 3x3 tap masks
            ],
            out_specs=pl.BlockSpec((1, Cout, P), lambda b: (b, 0, 0)),
        ),
        compiler_params=pltpu.CompilerParams(
            dimension_semantics=("parallel",)),
    )(x1f, x2f, kp["wt_k"], kp["bt_k"], perm,
      kp["w1_k"], kp["s1"], kp["b1"], drop_mask_flat,
      kp["w2_k"], kp["s2"], kp["b2"], kp["wr_k"],
      kp["gn_g"], kp["gn_b"], kp["gm"], kp["gmt"], mask9)

    # Lane-dense NCHW-native output: just un-flatten the spatial dims.
    return out_flat.reshape(N, Cout, Hh, Ww)


# --------------------------------------------------------------------------
# Pure-JAX reference (mirrors the PyTorch forward) for the correctness check.
# --------------------------------------------------------------------------
def reference_forward(x1_nhwc, x2_nhwc, rp, drop_mask_nhwc):
    N, H, W, C1 = x1_nhwc.shape
    # ConvTranspose2d(k=2, s=2): weight (Cin, Cout, 2, 2)
    y = jnp.einsum("nhwi,iouv->nhuwvo", x1_nhwc, rp["wt"],
                   precision=jax.lax.Precision.HIGHEST)
    up = y.reshape(N, 2 * H, 2 * W, C1) + rp["bt"]
    dh = x2_nhwc.shape[1] - up.shape[1]
    dw = x2_nhwc.shape[2] - up.shape[2]
    up = jnp.pad(up, ((0, 0), (dh, 0), (dw, 0), (0, 0)))
    x = jnp.concatenate([x2_nhwc, up], axis=-1)

    def conv3x3(z, w_pt, b_pt):
        w = jnp.transpose(w_pt, (2, 3, 1, 0))  # OIHW -> HWIO
        out = jax.lax.conv_general_dilated(
            z, w, (1, 1), ((1, 1), (1, 1)),
            dimension_numbers=("NHWC", "HWIO", "NHWC"),
            precision=jax.lax.Precision.HIGHEST)
        return out + b_pt

    def bn(z, g, b, m, v):
        return (z - m) * jax.lax.rsqrt(v + BN_EPS) * g + b

    h = bn(conv3x3(x, rp["w1"], rp["cb1"]), rp["g1"], rp["be1"], rp["m1"], rp["v1"])
    h = jnp.maximum(h, 0.0) * drop_mask_nhwc
    ft1 = bn(conv3x3(h, rp["w2"], rp["cb2"]), rp["g2"], rp["be2"], rp["m2"], rp["v2"])

    r = jnp.einsum("nhwi,oi->nhwo", x, rp["wr"], precision=jax.lax.Precision.HIGHEST)
    C = r.shape[-1]
    G = rp["group_num"]
    cg = C // G
    rr = r.reshape(N, r.shape[1] * r.shape[2], G, cg)
    mu = rr.mean(axis=(1, 3), keepdims=True)
    var = ((rr - mu) ** 2).mean(axis=(1, 3), keepdims=True)
    gn = ((rr - mu) * jax.lax.rsqrt(var + GN_EPS)).reshape(r.shape)
    gn = gn * rp["gn_g"] + rp["gn_b"]
    return jnp.maximum(gn + ft1, 0.0)


# --------------------------------------------------------------------------
if __name__ == "__main__":
    # RU_up_MCD(out_ch=16, in_ch=16, in_ch_skip=0, bilinear=False, with_skip=True)
    N, in_ch, out_ch = 2, 16, 16
    C1 = in_ch // 2          # channels of x1 and x2 (UNet convention)
    Cin = in_ch              # in_ch + in_ch_skip
    H, W = 8, 8              # x1 spatial; x2 is 2H x 2W
    p_drop = 0.5

    # group_num selection logic from the module
    group_num = 32
    if out_ch % 32 == 0 and out_ch >= 32:
        if out_ch % 24 == 0:
            group_num = 24
    elif out_ch % 16 == 0 and out_ch >= 16:
        group_num = 16

    key = jax.random.PRNGKey(0)
    ks = jax.random.split(key, 24)
    x1_nchw = jax.random.normal(ks[0], (N, C1, H, W), jnp.float32)
    x2_nchw = jax.random.normal(ks[1], (N, C1, 2 * H, 2 * W), jnp.float32)

    # Deterministic synthetic parameters (PyTorch layouts)
    wt = 0.2 * jax.random.normal(ks[2], (C1, C1, 2, 2), jnp.float32)   # ConvTranspose2d
    bt = 0.1 * jax.random.normal(ks[3], (C1,), jnp.float32)
    w1 = 0.1 * jax.random.normal(ks[4], (out_ch, Cin, 3, 3), jnp.float32)
    cb1 = 0.1 * jax.random.normal(ks[5], (out_ch,), jnp.float32)
    g1 = 1.0 + 0.1 * jax.random.normal(ks[6], (out_ch,), jnp.float32)
    be1 = 0.1 * jax.random.normal(ks[7], (out_ch,), jnp.float32)
    m1 = 0.1 * jax.random.normal(ks[8], (out_ch,), jnp.float32)
    v1 = 0.5 + jax.random.uniform(ks[9], (out_ch,), jnp.float32)
    w2 = 0.1 * jax.random.normal(ks[10], (out_ch, out_ch, 3, 3), jnp.float32)
    cb2 = 0.1 * jax.random.normal(ks[11], (out_ch,), jnp.float32)
    g2 = 1.0 + 0.1 * jax.random.normal(ks[12], (out_ch,), jnp.float32)
    be2 = 0.1 * jax.random.normal(ks[13], (out_ch,), jnp.float32)
    m2 = 0.1 * jax.random.normal(ks[14], (out_ch,), jnp.float32)
    v2 = 0.5 + jax.random.uniform(ks[15], (out_ch,), jnp.float32)
    wr = 0.1 * jax.random.normal(ks[16], (out_ch, Cin), jnp.float32)    # 1x1 conv, no bias
    gn_g = 1.0 + 0.1 * jax.random.normal(ks[17], (out_ch,), jnp.float32)
    gn_b = 0.1 * jax.random.normal(ks[18], (out_ch,), jnp.float32)

    # MC-dropout mask (always active), pre-scaled by 1/(1-p), deterministic.
    # Drawn in NCHW order (kernel is channel-major); reference gets the NHWC view.
    keep = jax.random.bernoulli(ks[19], 1.0 - p_drop, (N, out_ch, 2 * H, 2 * W))
    drop_mask_nchw = keep.astype(jnp.float32) / (1.0 - p_drop)
    drop_mask_flat = drop_mask_nchw.reshape(N, out_ch, 4 * H * W)
    drop_mask_nhwc = jnp.transpose(drop_mask_nchw, (0, 2, 3, 1))

    # Kernel-side parameter prep: fold BN into scale/bias, channel-major layouts.
    s1 = g1 / jnp.sqrt(v1 + BN_EPS)
    b1f = be1 + s1 * (cb1 - m1)
    s2 = g2 / jnp.sqrt(v2 + BN_EPS)
    b2f = be2 + s2 * (cb2 - m2)
    cg = out_ch // group_num
    gm = (jnp.arange(group_num)[:, None] ==
          (jnp.arange(out_ch)[None, :] // cg)).astype(jnp.float32)   # (G, Cout)

    kp = dict(
        # ConvTranspose2d weight (Cin, Cout, 2, 2) -> stacked (4*C1, C1), d = dh*2+dw
        wt_k=jnp.transpose(wt, (2, 3, 1, 0)).reshape(4 * C1, C1),
        # Stacked per-phase bias: row d*C1 + co holds bt[co]
        bt_k=jnp.tile(bt, 4).reshape(4 * C1, 1),
        # Conv weights OIHW -> (Cout, 9*Cin) with column index = (kh*3+kw)*Cin + ci
        w1_k=jnp.transpose(w1, (0, 2, 3, 1)).reshape(out_ch, 9 * Cin),
        s1=s1.reshape(out_ch, 1), b1=b1f.reshape(out_ch, 1),
        w2_k=jnp.transpose(w2, (0, 2, 3, 1)).reshape(out_ch, 9 * out_ch),
        s2=s2.reshape(out_ch, 1), b2=b2f.reshape(out_ch, 1),
        wr_k=wr,                                    # (Cout, Cin)
        gn_g=gn_g.reshape(out_ch, 1), gn_b=gn_b.reshape(out_ch, 1),
        gm=gm, gmt=gm.T,
    )

    out_nchw = ru_up_mcd_forward(x1_nchw, x2_nchw, kp, drop_mask_flat)
    out_nchw = jax.block_until_ready(out_nchw)
    assert out_nchw.shape == (N, out_ch, 2 * H, 2 * W)

    # Reference check against a pure-JAX mirror of the PyTorch forward.
    rp = dict(wt=wt, bt=bt, w1=w1, cb1=cb1, g1=g1, be1=be1, m1=m1, v1=v1,
              w2=w2, cb2=cb2, g2=g2, be2=be2, m2=m2, v2=v2, wr=wr,
              gn_g=gn_g, gn_b=gn_b, group_num=group_num)
    ref_nhwc = reference_forward(jnp.transpose(x1_nchw, (0, 2, 3, 1)),
                                 jnp.transpose(x2_nchw, (0, 2, 3, 1)),
                                 rp, drop_mask_nhwc)
    ref_nchw = jnp.transpose(ref_nhwc, (0, 3, 1, 2))
    if not jnp.allclose(out_nchw, ref_nchw, rtol=2e-3, atol=2e-3):
        max_err = float(jnp.max(jnp.abs(out_nchw - ref_nchw)))
        raise AssertionError(f"mismatch vs reference, max abs err = {max_err}")

    print("KERNEL_OK")
</pallas_src>

<mosaic_0001>
module attributes {stable_mosaic.version = 11 : i64} {
  func.func @_roll_probe_kernel(%arg0: memref<8x128xf32, #tpu.memory_space<vmem>>, %arg1: memref<8x128xf32, #tpu.memory_space<vmem>>) attributes {dimension_semantics = [], scalar_prefetch = 0 : i64, scratch_operands = 0 : i64, tpu.core_type = #tpu.core_type<tc>} {
    %c0 = arith.constant 0 : index
    %c0_0 = arith.constant 0 : index
    %0 = vector.load %arg0[%c0, %c0_0] : memref<8x128xf32, #tpu.memory_space<vmem>>, vector<8x128xf32>
    %c1_i32 = arith.constant 1 : i32
    %1 = tpu.dynamic_rotate %0 by %c1_i32 dim 1 : vector<8x128xf32>, i32 -> vector<8x128xf32>
    %c0_1 = arith.constant 0 : index
    %c0_2 = arith.constant 0 : index
    %2 = vector.load %arg1[%c0_1, %c0_2] : memref<8x128xf32, #tpu.memory_space<vmem>>, vector<8x128xf32>
    tpu.vector_store %arg1[%c0_1, %c0_2], %1 {strides = array<i32>} : memref<8x128xf32, #tpu.memory_space<vmem>>, vector<8x128xf32>,
    return
  }
}

</mosaic_0001>

<bundles_post_ra>
// kernel: tpu_custom_call.1
= control target key start
LH: loop header
LB: loop body
LE: loop exit
PB: predicated region body
PF: predicated region fallthrough
CT: control target
= control target key end

     0   :  { %6 = vsyncpa [#allocation3], 0  ;;  %s128_s0 = inlined_call_operand.hbm [shape: f32[8,128], index: 0, kind: input, shape index: {}]   ;;  %s129_s1 = inlined_call_operand.hbm [shape: f32[8,128], index: 1, kind: output, shape index: {}]  }
   0x1   :  { %7 = vsyncpa [#allocation4], 0  ;;  %s91_s6 = smov [#allocation2]   ;;  %s43_s10 = scalar_lea.hbm %s128_s0, 128 }
   0x2   :  { %s14_s7 = sshll.u32 %s91_s6, 4  ;;  %p44_p0 = scmp.ne.s32.totalorder %s128_s0, %s43_s10  ;;  %s15_s7 = int_to_ptr.vmem [resolvable:$true] %s14_s7 }
   0x3   :  { %p47_p1 = scmp.lt.u32.totalorder %s43_s10, %s128_s0 }
   0x5   :  { %p49_p2 = pnand %p47_p1, %p44_p0 }
   0x7   :  { %52 = shalt.err (!%p49_p2)
}
   0x8   :  { %s53_s15 = scalar_lea.vmem %s15_s7, 128  ;;  %p58_p4 = scmp.lt.s32.totalorder %s15_s7, %s15_s7 }
   0x9   :  { %p54_p3 = scmp.ne.s32.totalorder %s15_s7, %s53_s15  ;;  %p59_p5 = scmp.lt.s32.totalorder %s53_s15, %s53_s15 }
   0xb   :  { %p60_p6 = por %p59_p5, %p58_p4 }
   0xd   :  { %p61_p7 = pnand %p60_p6, %p54_p3 }
   0xf   :  { %64 = shalt.err (!%p61_p7)
}
  0x10   :  { %17 = dma.hbm_to_vmem [thread:$0]  %s128_s0, 128, %s15_s7, [#allocation3]  }
  0x11   :  { %87 = dma.done.wait [#allocation3], 128  }
  0x12   :  { %88 = vsyncadd [#allocation3], 4294967168  ;;  %v21_v0 = vld [vmem:[#allocation2] sm:$0xff]  ;;  %s92_s18 = smov 1   ;;  %s93_s19 = smov [#allocation5]  }
  0x13   :  { %22 = vrot.lane.b32.xlu0 %v21_v0, %s92_s18  ;;  %s31_s20 = sshll.u32 %s93_s19, 4  ;;  %s32_s20 = int_to_ptr.vmem [resolvable:$true] %s31_s20 }
  0x14   :  { %s65_s21 = scalar_lea.vmem %s32_s20, 128  ;;  %p70_p9 = scmp.lt.s32.totalorder %s32_s20, %s32_s20 }
  0x15   :  { %p66_p8 = scmp.ne.s32.totalorder %s32_s20, %s65_s21  ;;  %p71_p10 = scmp.lt.s32.totalorder %s65_s21, %s65_s21 }
  0x17   :  { %p72_p11 = por %p71_p10, %p70_p9 }
  0x19   :  { %p73_p12 = pnand %p72_p11, %p66_p8 }
  0x85   :  { %v23_v1 = vpop.permute.xlu0 %22 }
  0x86   :  { %24 = vst [vmem:[#allocation5] sm:$0xff] %v23_v1 }
  0x87   :  { %76 = shalt.err (!%p73_p12)
}
  0x88   :  { %s77_s0 = scalar_lea.hbm %s129_s1, 128 }
  0x89   :  { %p78_p13 = scmp.ne.s32.totalorder %s129_s1, %s77_s0  ;;  %p81_p0 = scmp.lt.u32.totalorder %s77_s0, %s129_s1 }
  0x8b   :  { %p83_p1 = pnand %p81_p0, %p78_p13 }
  0x8d   :  { %86 = shalt.err (!%p83_p1)
}
  0x8e   :  { %34 = dma.vmem_to_hbm [thread:$0]  %s32_s20, 128, %s129_s1, [#allocation4]  }
  0x8f   :  { %89 = dma.done.wait [#allocation4], 128  }
  0x90   :  { %90 = vsyncadd [#allocation4], 4294967168 }
  0x91   :  { %38 = vsyncpa [#allocation3], 1 }
  0x92   :  { %39 = vsyncpa [#allocation4], 1 }

</bundles_post_ra>
